<compile_context>
chip_gen: v7x
topology: tpu7x:2x2x1
jax: 0.10.0
libtpu: 0.0.40
codegen_flags: <defaults>
</compile_context>

<pallas_src>
import functools

import jax
import jax.numpy as jnp
from jax.experimental import pallas as pl
from jax.experimental.pallas import tpu as pltpu


def _round_up(x, m):
    return ((x + m - 1) // m) * m


def _pick_tile(total, cap):
    """Largest tile <= cap that divides `total` (a multiple of 128) and is a multiple of 128."""
    units = total // 128
    n = -(-total // cap)          # ceil(total / cap)
    while units % n:
        n += 1
    return (units // n) * 128


# ----------------------------------------------------------------------------
# Pallas kernels
# ----------------------------------------------------------------------------
def _mm_kernel(*refs, activation, has_residual):
    """out = act(A @ B + bias [+ residual]); bf16 operands, f32 accumulator over K grid."""
    if has_residual:
        a_ref, b_ref, bias_ref, res_ref, o_ref, acc_ref = refs
    else:
        a_ref, b_ref, bias_ref, o_ref, acc_ref = refs
        res_ref = None

    @pl.when(pl.program_id(2) == 0)
    def _():
        acc_ref[...] = jnp.zeros_like(acc_ref)

    acc_ref[...] += jnp.dot(a_ref[...], b_ref[...],
                            preferred_element_type=jnp.float32)

    @pl.when(pl.program_id(2) == pl.num_programs(2) - 1)
    def _():
        r = acc_ref[...] + bias_ref[...]
        if has_residual:
            r = r + res_ref[...].astype(jnp.float32)
        if activation == "relu":
            r = jnp.maximum(r, 0.0)
        o_ref[...] = r.astype(o_ref.dtype)


def _maxpool2x2_kernel(x_ref, o_ref):
    """x block: (tr, 2, Wo, 2, C) -> o block: (tr, Wo, C); 2x2 max via two pairwise maxima
    (row pairs on a leading axis, column pairs on the sublane axis — no lane shuffles)."""
    x = x_ref[...]
    h = jnp.maximum(x[:, 0], x[:, 1])                       # (tr, Wo, 2, C)
    o_ref[...] = jnp.maximum(h[:, :, 0, :], h[:, :, 1, :])  # (tr, Wo, C)


# ----------------------------------------------------------------------------
# Pallas wrappers
# ----------------------------------------------------------------------------
def matmul_bias_act(a, b, bias, activation="none", residual=None,
                    out_dtype=jnp.float32):
    """act(a[M,K] @ b[K,N] + bias[N] [+ residual[M,N]]) on the MXU (bf16 in, f32 acc).

    M is never padded (ragged last block is masked by Pallas); K is zero-padded to a
    multiple of 128 only if needed (network layers arrive pre-padded); N uses a single
    full-dim block when it is not a multiple of 128 (no pad / no output slice)."""
    M, K = a.shape
    K2, N = b.shape
    assert K == K2 and bias.shape == (N,)

    a = a.astype(jnp.bfloat16)
    b = b.astype(jnp.bfloat16)

    Kp = _round_up(K, 128)
    if Kp != K:                      # only the tiny self-check shapes hit this path
        a = jnp.pad(a, ((0, 0), (0, Kp - K)))
        b = jnp.pad(b, ((0, Kp - K), (0, 0)))

    small_m = M <= 16                # batch-sized classifier GEMVs + tiny score fusions
    tk = _pick_tile(Kp, 2048)
    tn = _pick_tile(N, 1024 if small_m else 512) if N % 128 == 0 else N
    tm = _round_up(M, 8) if small_m else min(256, _round_up(M, 8))

    bias2 = bias.astype(jnp.float32).reshape(1, N)
    grid = (pl.cdiv(M, tm), pl.cdiv(N, tn), Kp // tk)

    # Deeper buffering on the weight operand for the pure weight-streaming GEMVs.
    b_kwargs = {}
    if small_m and grid[2] >= 3:
        b_kwargs = dict(pipeline_mode=pl.Buffered(3))

    operands = [a, b, bias2]
    in_specs = [
        pl.BlockSpec((tm, tk), lambda i, j, k: (i, k)),
        pl.BlockSpec((tk, tn), lambda i, j, k: (k, j), **b_kwargs),
        pl.BlockSpec((1, tn), lambda i, j, k: (0, j)),
    ]
    has_residual = residual is not None
    if has_residual:
        assert residual.shape == (M, N), (residual.shape, (M, N))
        operands.append(residual)    # stays bf16; cast to f32 happens in the epilogue
        in_specs.append(pl.BlockSpec((tm, tn), lambda i, j, k: (i, j)))

    kernel = functools.partial(_mm_kernel, activation=activation,
                               has_residual=has_residual)
    out = pl.pallas_call(
        kernel,
        out_shape=jax.ShapeDtypeStruct((M, N), out_dtype),
        grid_spec=pltpu.PrefetchScalarGridSpec(
            num_scalar_prefetch=0,
            grid=grid,
            in_specs=in_specs,
            out_specs=pl.BlockSpec((tm, tn), lambda i, j, k: (i, j)),
            scratch_shapes=[pltpu.VMEM((tm, tn), jnp.float32)],
        ),
        compiler_params=pltpu.CompilerParams(
            dimension_semantics=("parallel", "parallel", "arbitrary"),
            vmem_limit_bytes=48 * 1024 * 1024),
    )(*operands)
    return out


def maxpool2x2_ceil(x):
    """MaxPool2d(kernel=2, stride=2, ceil_mode=True) as one Pallas kernel (NHWC)."""
    N, H, W, C = x.shape
    Ho, Wo = -(-H // 2), -(-W // 2)
    neg = float(jnp.finfo(x.dtype).min)
    if (2 * Ho, 2 * Wo) != (H, W):
        x = jnp.pad(x, ((0, 0), (0, 2 * Ho - H), (0, 2 * Wo - W), (0, 0)),
                    constant_values=neg)
    R = N * Ho
    xr = x.reshape(R, 2, Wo, 2, C)                 # free row-major reshape
    row_bytes = 2 * Wo * 2 * C * x.dtype.itemsize
    tr = int(max(1, min(R, (8 * 1024 * 1024) // row_bytes)))
    out = pl.pallas_call(
        _maxpool2x2_kernel,
        out_shape=jax.ShapeDtypeStruct((R, Wo, C), x.dtype),
        grid=(pl.cdiv(R, tr),),
        in_specs=[pl.BlockSpec((tr, 2, Wo, 2, C), lambda i: (i, 0, 0, 0, 0))],
        out_specs=pl.BlockSpec((tr, Wo, C), lambda i: (i, 0, 0)),
        compiler_params=pltpu.CompilerParams(
            dimension_semantics=("parallel",),
            vmem_limit_bytes=48 * 1024 * 1024),
    )(xr)
    return out.reshape(N, Ho, Wo, C)


# ----------------------------------------------------------------------------
# Layer glue (im2col / phase decomposition) in plain JAX; hot matmul in Pallas
# ----------------------------------------------------------------------------
def conv2d_nhwc(x, w_mat, bias, K, padding, relu, out_dtype=jnp.bfloat16,
                residual=None):
    """KxK conv, stride 1, zero pad `padding`; optional fused residual add in epilogue.
    w_mat rows follow im2col ordering (kh, kw, cin) and may be zero-row-padded to a
    multiple of 128; matching zero columns are appended for free in the concatenate."""
    x = x.astype(jnp.bfloat16)
    N = x.shape[0]
    if padding:
        x = jnp.pad(x, ((0, 0), (padding, padding), (padding, padding), (0, 0)))
    Hp, Wp, C = x.shape[1:]
    Ho, Wo = Hp - K + 1, Wp - K + 1
    Kdim, Krows = K * K * C, w_mat.shape[0]
    if K == 1 and Krows == Kdim:
        patches = x
    else:
        # TODO(synk): im2col is still materialised in HBM; a fused shifted-window conv
        #             kernel (manual DMA halo) would cut early-layer traffic further.
        cols = [x[:, kh:kh + Ho, kw:kw + Wo, :] for kh in range(K) for kw in range(K)]
        if Krows > Kdim:
            cols.append(jnp.zeros((N, Ho, Wo, Krows - Kdim), jnp.bfloat16))
        patches = jnp.concatenate(cols, axis=-1)
    a = patches.reshape(N * Ho * Wo, Krows)
    res = None if residual is None else residual.reshape(N * Ho * Wo, -1)
    out = matmul_bias_act(a, w_mat, bias, "relu" if relu else "none",
                          residual=res, out_dtype=out_dtype)
    return out.reshape(N, Ho, Wo, -1)


def make_phase_deconv_weight(wt, k, s, cin_pad, cout_keep):
    """ConvTranspose2d(C, C, k, stride=s, bias=False), torch-layout wt (cin, cout, k, k),
    rewritten as a sub-pixel phase GEMM weight of shape (4*cin_pad, s*s*cout_keep):
    a regular 2x2 conv (padding 1) on the UNdilated input whose output channels hold all
    s^2 phases, followed by depth-to-space.  Requires k == 2*s (true for 4/2 and 16/8)."""
    assert k == 2 * s
    cin_l, cout_l = wt.shape[0], wt.shape[1]
    u = jnp.arange(2)
    p = jnp.arange(s)
    di = p[None, :] + s * (1 - u)[:, None]                      # tap index per (u, phase)
    w6 = wt[:, :, di[:, :, None, None], di[None, None, :, :]]   # (ci, co, 2, s, 2, s)
    w6 = jnp.transpose(w6, (2, 4, 0, 3, 5, 1))                  # (u, v, ci, p, q, co)
    w6 = jnp.pad(w6, ((0, 0), (0, 0), (0, cin_pad - cin_l),
                      (0, 0), (0, 0), (0, cout_keep - cout_l)))
    return w6.reshape(4 * cin_pad, s * s * cout_keep).astype(jnp.bfloat16)


def conv_transpose2d_phase(x, w_gemm, s, cout, out_dtype=jnp.bfloat16):
    """Sub-pixel transposed conv (stride s, kernel 2s): no zero-dilated input, hence no
    structurally-zero MACs.  x: (N, H, W, Cp) -> (N, s*(H+1), s*(W+1), cout)."""
    N, H, W, _ = x.shape
    zero_b = jnp.zeros((w_gemm.shape[1],), jnp.float32)
    y = conv2d_nhwc(x, w_gemm, zero_b, 2, 1, relu=False, out_dtype=out_dtype)
    y = y.reshape(N, H + 1, W + 1, s, s, cout)
    y = jnp.transpose(y, (0, 1, 3, 2, 4, 5))        # depth-to-space interleave
    return y.reshape(N, (H + 1) * s, (W + 1) * s, cout)


def _bilinear_deconv_wt(channels, k):
    """torch get_upsampling_weight for ConvTranspose2d(ch, ch, k): (cin, cout, k, k)."""
    factor = (k + 1) // 2
    center = (factor - 1) if k % 2 == 1 else (factor - 0.5)
    og = jnp.arange(k, dtype=jnp.float32)
    f1 = 1.0 - jnp.abs(og - center) / factor
    filt = f1[:, None] * f1[None, :]
    eye = jnp.eye(channels, dtype=jnp.float32)
    return eye[:, :, None, None] * filt[None, None, :, :]


def _conv_transpose_ref(x_nhwc, wt, s):
    """Reference ConvTranspose2d (torch semantics) via input dilation + flipped kernel."""
    k = wt.shape[-1]
    w_hwio = jnp.transpose(wt[:, :, ::-1, ::-1], (2, 3, 0, 1))
    return jax.lax.conv_general_dilated(
        x_nhwc, w_hwio, window_strides=(1, 1),
        padding=[(k - 1, k - 1), (k - 1, k - 1)],
        lhs_dilation=(s, s),
        dimension_numbers=("NHWC", "HWIO", "NHWC"))


# ----------------------------------------------------------------------------
# fcn8s: parameters + forward
# ----------------------------------------------------------------------------
IN_CHANNELS = 3
N_CLASSES = 21
CLS_PAD = 128          # n_classes kept padded to a full lane width through the decoder

# (kernel_size, padding, cin, cout) — fixed by the PyTorch module's __init__.
_BLOCK_CFG = [
    [(3, 100, IN_CHANNELS, 64), (3, 1, 64, 64)],
    [(3, 1, 64, 128), (3, 1, 128, 128)],
    [(3, 1, 128, 256), (3, 1, 256, 256), (3, 1, 256, 256)],
    [(3, 1, 256, 512), (3, 1, 512, 512), (3, 1, 512, 512)],
    [(3, 1, 512, 512), (3, 1, 512, 512), (3, 1, 512, 512)],
]
_FC6_CFG = (7, 0, 512, 4096)
_FC7_CFG = (1, 0, 4096, 4096)


def _make_conv(key, K, cin, cout, cout_pad=None):
    kw, kb = jax.random.split(key)
    std = (2.0 / (K * K * cin)) ** 0.5            # He init keeps activations O(1)
    w = jax.random.normal(kw, (K, K, cin, cout), jnp.float32) * std
    b = jax.random.normal(kb, (cout,), jnp.float32) * 0.01
    if cout_pad is not None and cout_pad != cout:
        w = jnp.pad(w, ((0, 0), (0, 0), (0, 0), (0, cout_pad - cout)))
        b = jnp.pad(b, (0, cout_pad - cout))
    rows = K * K * cin
    w = w.reshape(rows, w.shape[-1])                          # im2col (kh, kw, cin) rows
    rows_p = _round_up(rows, 128)
    if rows_p != rows:                                        # pre-pad K rows once
        w = jnp.pad(w, ((0, rows_p - rows), (0, 0)))
    return (w.astype(jnp.bfloat16), b)


def init_params(key):
    params = {"blocks": []}
    for blk in _BLOCK_CFG:
        layers = []
        for (K, _pad, cin, cout) in blk:
            key, sub = jax.random.split(key)
            layers.append(_make_conv(sub, K, cin, cout))
        params["blocks"].append(layers)
    for name, (K, _pad, cin, cout) in (("fc6", _FC6_CFG), ("fc7", _FC7_CFG)):
        key, sub = jax.random.split(key)
        params[name] = _make_conv(sub, K, cin, cout)
    # 21-class heads: output channels padded once to CLS_PAD (kept padded through the
    # whole decoder; cropped back to 21 classes only at the very end).
    for name, cin in (("score_fr", 4096), ("score_pool4", 512), ("score_pool3", 256)):
        key, sub = jax.random.split(key)
        params[name] = _make_conv(sub, 1, cin, N_CLASSES, cout_pad=CLS_PAD)
    # learned_billinear=True: ConvTranspose2d weights initialised to bilinear upsampling,
    # stored in sub-pixel (phase-decomposed) GEMM form.
    params["upscore2"] = make_phase_deconv_weight(
        _bilinear_deconv_wt(N_CLASSES, 4), 4, 2, CLS_PAD, CLS_PAD)
    params["upscore4"] = make_phase_deconv_weight(
        _bilinear_deconv_wt(N_CLASSES, 4), 4, 2, CLS_PAD, CLS_PAD)
    params["upscore8"] = make_phase_deconv_weight(
        _bilinear_deconv_wt(N_CLASSES, 16), 16, 8, CLS_PAD, N_CLASSES)
    return params


@jax.jit
def fcn8s_forward(params, x_nchw):
    """Forward pass of fcn8s (n_classes=21, learned_billinear=True)."""
    x = jnp.transpose(x_nchw, (0, 2, 3, 1)).astype(jnp.bfloat16)   # NCHW -> NHWC
    h = x
    pools = []
    for layers, cfgs in zip(params["blocks"], _BLOCK_CFG):
        for (w, b), (K, pad, _ci, _co) in zip(layers, cfgs):
            h = conv2d_nhwc(h, w, b, K, pad, relu=True)
        h = maxpool2x2_ceil(h)
        pools.append(h)
    conv3, conv4, conv5 = pools[2], pools[3], pools[4]

    # classifier: conv7x7 + ReLU, Dropout2d, conv1x1 + ReLU, Dropout2d, conv1x1
    # TODO(synk): Dropout2d is treated as identity (inference semantics).
    w, b = params["fc6"]
    score = conv2d_nhwc(conv5, w, b, 7, 0, relu=True)
    w, b = params["fc7"]
    score = conv2d_nhwc(score, w, b, 1, 0, relu=True)
    w, b = params["score_fr"]
    score = conv2d_nhwc(score, w, b, 1, 0, relu=False)        # (N, Hs, Ws, 128) bf16

    # upscore2 = ConvTranspose2d(21, 21, 4, stride=2, bias=False)(score), phase form
    upscore2 = conv_transpose2d_phase(score, params["upscore2"], 2, CLS_PAD)
    h2, w2 = upscore2.shape[1], upscore2.shape[2]

    # upscore2 + score_pool4(conv4)[:, 5:5+h2, 5:5+w2]; the add is fused into the
    # 1x1-conv epilogue (a 1x1 conv commutes with the spatial crop).
    ww, bb = params["score_pool4"]
    conv4c = conv4[:, 5:5 + h2, 5:5 + w2, :]
    fused4 = conv2d_nhwc(conv4c, ww, bb, 1, 0, relu=False, residual=upscore2)

    upscore_pool4 = conv_transpose2d_phase(fused4, params["upscore4"], 2, CLS_PAD)
    h4, w4 = upscore_pool4.shape[1], upscore_pool4.shape[2]

    ww, bb = params["score_pool3"]
    conv3c = conv3[:, 9:9 + h4, 9:9 + w4, :]
    fused3 = conv2d_nhwc(conv3c, ww, bb, 1, 0, relu=False, residual=upscore_pool4)

    # upscore8 emits only the 21 real classes per phase (final crop target).
    out = conv_transpose2d_phase(fused3, params["upscore8"], 8, N_CLASSES)
    Hin, Win = x.shape[1], x.shape[2]
    out = out[:, 31:31 + Hin, 31:31 + Win, :]
    return jnp.transpose(out, (0, 3, 1, 2)).astype(jnp.float32)    # back to NCHW


# ----------------------------------------------------------------------------
# main
# ----------------------------------------------------------------------------
if __name__ == "__main__":
    key = jax.random.PRNGKey(0)
    key, kx, kt = jax.random.split(key, 3)

    # 1) numerical self-check of the Pallas matmul kernel (ragged M block, non-128 K/N,
    #    bf16 operands, f32 accumulate)
    ka, kb2, kbias = jax.random.split(kt, 3)
    a = jax.random.normal(ka, (37, 150), jnp.float32)
    bm = jax.random.normal(kb2, (150, 45), jnp.float32)
    bias = jax.random.normal(kbias, (45,), jnp.float32)
    af = a.astype(jnp.bfloat16).astype(jnp.float32)
    bf = bm.astype(jnp.bfloat16).astype(jnp.float32)
    ref = jnp.maximum(af @ bf + bias[None, :], 0.0)
    got = matmul_bias_act(a, bm, bias, "relu", out_dtype=jnp.float32)
    assert jnp.allclose(ref, got, rtol=5e-2, atol=5e-2), "matmul kernel mismatch"

    # 2) sub-pixel transposed-conv check against a lax reference (random, non-diagonal wt)
    kw_, kx2 = jax.random.split(ka)
    cin = 8
    wt = jax.random.normal(kw_, (cin, cin, 4, 4), jnp.float32)
    xd = jax.random.normal(kx2, (1, 5, 6, cin), jnp.float32)
    wt_b = wt.astype(jnp.bfloat16).astype(jnp.float32)
    xd_b = xd.astype(jnp.bfloat16).astype(jnp.float32)
    ref_t = _conv_transpose_ref(xd_b, wt_b, 2)
    wg = make_phase_deconv_weight(wt, 4, 2, cin, cin)
    got_t = conv_transpose2d_phase(xd, wg, 2, cin, out_dtype=jnp.float32)
    assert got_t.shape == ref_t.shape, (got_t.shape, ref_t.shape)
    assert jnp.allclose(ref_t, got_t, rtol=2e-2, atol=2e-2), "phase deconv mismatch"

    params = init_params(key)

    # padding=100 in the first conv makes small inputs valid: a 16x16 image gives a
    # 7x7 conv5 -> 1x1 classifier map and exercises the full fcn8s skip/deconv pipeline.
    x = jax.random.normal(kx, (1, IN_CHANNELS, 16, 16), jnp.float32)

    out = fcn8s_forward(params, x)
    out = jax.block_until_ready(out)
    assert out.shape == (1, N_CLASSES, 16, 16), out.shape
    assert bool(jnp.all(jnp.isfinite(out)))
    print("KERNEL_OK")
</pallas_src>

<mosaic_0001>
module attributes {stable_mosaic.version = 11 : i64} {
  func.func @_mm_kernel(%arg0: i32, %arg1: i32, %arg2: i32, %arg3: memref<40x256xbf16, #tpu.memory_space<vmem>>, %arg4: memref<256x45xbf16, #tpu.memory_space<vmem>>, %arg5: memref<1x45xf32, #tpu.memory_space<vmem>>, %arg6: memref<40x45xf32, #tpu.memory_space<vmem>>, %arg7: memref<40x45xf32, #tpu.memory_space<vmem>>) attributes {dimension_semantics = [#tpu.dimension_semantics<parallel>, #tpu.dimension_semantics<parallel>, #tpu.dimension_semantics<arbitrary>], iteration_bounds = array<i64: 1, 1, 1>, scalar_prefetch = 0 : i64, scratch_operands = 1 : i64, tpu.core_type = #tpu.core_type<tc>, window_params = [{transform_indices = @transform_0, window_bounds = array<i64: 40, 256>}, {transform_indices = @transform_1, window_bounds = array<i64: 256, 45>}, {transform_indices = @transform_2, window_bounds = array<i64: 1, 45>}, {transform_indices = @transform_3, window_bounds = array<i64: 40, 45>}]} {
    %c0_i32 = arith.constant 0 : i32
    %0 = arith.cmpi eq, %arg2, %c0_i32 : i32
    %1 = arith.extui %0 : i1 to i32
    %c0_i32_0 = arith.constant 0 : i32
    %2 = arith.cmpi ne, %1, %c0_i32_0 : i32
    scf.if %2 {
      %cst_10 = arith.constant 0.000000e+00 : f32
      %12 = vector.broadcast %cst_10 : f32 to vector<40x45xf32>
      %c0_11 = arith.constant 0 : index
      %c0_12 = arith.constant 0 : index
      %13 = vector.load %arg7[%c0_11, %c0_12] : memref<40x45xf32, #tpu.memory_space<vmem>>, vector<40x45xf32>
      tpu.vector_store %arg7[%c0_11, %c0_12], %12 {strides = array<i32>} : memref<40x45xf32, #tpu.memory_space<vmem>>, vector<40x45xf32>,
    } else {
    }
    %c0 = arith.constant 0 : index
    %c0_1 = arith.constant 0 : index
    %3 = vector.load %arg7[%c0, %c0_1] : memref<40x45xf32, #tpu.memory_space<vmem>>, vector<40x45xf32>
    %c0_2 = arith.constant 0 : index
    %c0_3 = arith.constant 0 : index
    %4 = vector.load %arg3[%c0_2, %c0_3] : memref<40x256xbf16, #tpu.memory_space<vmem>>, vector<40x256xbf16>
    %c0_4 = arith.constant 0 : index
    %c0_5 = arith.constant 0 : index
    %5 = vector.load %arg4[%c0_4, %c0_5] : memref<256x45xbf16, #tpu.memory_space<vmem>>, vector<256x45xbf16>
    %cst = arith.constant dense<0.000000e+00> : vector<40x45xf32>
    %6 = tpu.matmul %4, %5, %cst {dimension_numbers = #tpu.dot_dimension_numbers<[1], [0], [0], [1], [0, 0, 1, 1], [], []>} : vector<40x256xbf16>, vector<256x45xbf16>, vector<40x45xf32> -> vector<40x45xf32>
    %7 = arith.addf %3, %6 : vector<40x45xf32>
    %c0_6 = arith.constant 0 : index
    %c0_7 = arith.constant 0 : index
    %8 = vector.load %arg7[%c0_6, %c0_7] : memref<40x45xf32, #tpu.memory_space<vmem>>, vector<40x45xf32>
    tpu.vector_store %arg7[%c0_6, %c0_7], %7 {strides = array<i32>} : memref<40x45xf32, #tpu.memory_space<vmem>>, vector<40x45xf32>,
    %c0_i32_8 = arith.constant 0 : i32
    %9 = arith.cmpi eq, %arg2, %c0_i32_8 : i32
    %10 = arith.extui %9 : i1 to i32
    %c0_i32_9 = arith.constant 0 : i32
    %11 = arith.cmpi ne, %10, %c0_i32_9 : i32
    scf.if %11 {
      %c0_10 = arith.constant 0 : index
      %c0_11 = arith.constant 0 : index
      %12 = vector.load %arg7[%c0_10, %c0_11] : memref<40x45xf32, #tpu.memory_space<vmem>>, vector<40x45xf32>
      %c0_12 = arith.constant 0 : index
      %c0_13 = arith.constant 0 : index
      %13 = vector.load %arg5[%c0_12, %c0_13] : memref<1x45xf32, #tpu.memory_space<vmem>>, vector<1x45xf32>
      %14 = vector.broadcast %13 : vector<1x45xf32> to vector<40x45xf32>
      %15 = arith.addf %12, %14 : vector<40x45xf32>
      %cst_14 = arith.constant 0.000000e+00 : f32
      %16 = vector.broadcast %cst_14 : f32 to vector<40x45xf32>
      %17 = arith.maximumf %15, %16 : vector<40x45xf32>
      %c0_15 = arith.constant 0 : index
      %c0_16 = arith.constant 0 : index
      %18 = vector.load %arg6[%c0_15, %c0_16] : memref<40x45xf32, #tpu.memory_space<vmem>>, vector<40x45xf32>
      tpu.vector_store %arg6[%c0_15, %c0_16], %17 {strides = array<i32>} : memref<40x45xf32, #tpu.memory_space<vmem>>, vector<40x45xf32>,
    } else {
    }
    return
  }
  func.func @transform_0(%arg0: i32, %arg1: i32, %arg2: i32) -> (i32, i32) {
    %c0_i32 = arith.constant 0 : i32
    return %arg0, %arg2 : i32, i32
  }
  func.func @transform_1(%arg0: i32, %arg1: i32, %arg2: i32) -> (i32, i32) {
    %c0_i32 = arith.constant 0 : i32
    return %arg2, %arg1 : i32, i32
  }
  func.func @transform_2(%arg0: i32, %arg1: i32, %arg2: i32) -> (i32, i32) {
    %c0_i32 = arith.constant 0 : i32
    %c0_i32_0 = arith.constant 0 : i32
    return %c0_i32, %arg1 : i32, i32
  }
  func.func @transform_3(%arg0: i32, %arg1: i32, %arg2: i32) -> (i32, i32) {
    %c0_i32 = arith.constant 0 : i32
    return %arg0, %arg1 : i32, i32
  }
}

</mosaic_0001>

<bundles_post_ra>
// kernel: tpu_custom_call.1
= control target key start
LH: loop header
LB: loop body
LE: loop exit
PB: predicated region body
PF: predicated region fallthrough
CT: control target
= control target key end

     0   :  { %s546_s0 = inlined_call_operand.vmem [shape: bf16[37,256], index: 0, kind: input, shape index: {}]   ;;  %s547_s1 = inlined_call_operand.vmem [shape: bf16[256,45], index: 1, kind: input, shape index: {}]   ;;  %s548_s2 = inlined_call_operand.vmem [shape: f32[1,45], index: 2, kind: input, shape index: {}]   ;;  %s549_s3 = inlined_call_operand.hbm [shape: f32[37,45], index: 3, kind: output, shape index: {}]  }
   0x1   :  { %v381_v0 = vld [vmem:[%s547_s1 + $0x40] sm:$0xff]   ;;  %v383_v2 = vld [vmem:[%s547_s1 + $0x48] sm:$0xff]   ;;  %v385_v4 = vld [vmem:[%s547_s1 + $0x50] sm:$0xff]  }
   0x2   :  { %v382_v1 = vld [vmem:[%s547_s1] sm:$0xff]   ;;  %361 = vmatprep.subr.bf16.mxu1 %v381_v0  ;;  %327 = vmatprep.subr.bf16.mxu0 %v381_v0  ;;  %v384_v3 = vld [vmem:[%s547_s1 + $0x8] sm:$0xff]   ;;  %v386_v5 = vld [vmem:[%s547_s1 + $0x10] sm:$0xff]  }
   0x3   :  { %369 = vmatpush3.bf16.msra.mxu1 %v382_v1  ;;  %328 = vmatpush3.bf16.msra.mxu0 %v382_v1  ;;  %v387_v6 = vld [vmem:[%s547_s1 + $0x58] sm:$0xff]   ;;  %v389_v8 = vld [vmem:[%s547_s1 + $0x60] sm:$0xff]   ;;  %v391_v10 = vld [vmem:[%s547_s1 + $0x68] sm:$0xff]  }
   0x4   :  { %362 = vmatprep.subr.bf16.mxu1 %v383_v2  ;;  %329 = vmatprep.subr.bf16.mxu0 %v383_v2  ;;  %v388_v7 = vld [vmem:[%s547_s1 + $0x18] sm:$0xff]   ;;  %v390_v9 = vld [vmem:[%s547_s1 + $0x20] sm:$0xff]   ;;  %v392_v13 = vld [vmem:[%s547_s1 + $0x28] sm:$0xff]  }
   0x5   :  { %v399_v11 = vld [vmem:[%s546_s0 + $0x14] ss:$8 sps:$4 sm:$0xff]   ;;  %v402_v12 = vld [vmem:[%s546_s0 + $0x4] ss:$8 sps:$4 sm:$0xff]  }
   0x7   :  { %370 = vmatpush3.bf16.msra.mxu1 %v384_v3  ;;  %330 = vmatpush3.bf16.msra.mxu0 %v384_v3 }
   0x8   :  { %363 = vmatprep.subr.bf16.mxu1 %v385_v4  ;;  %331 = vmatprep.subr.bf16.mxu0 %v385_v4 }
   0xb   :  { %371 = vmatpush3.bf16.msra.mxu1 %v386_v5  ;;  %332 = vmatpush3.bf16.msra.mxu0 %v386_v5 }
   0xc   :  { %364 = vmatprep.subr.bf16.mxu1 %v387_v6  ;;  %333 = vmatprep.subr.bf16.mxu0 %v387_v6 }
   0xf   :  { %372 = vmatpush3.bf16.msra.mxu1 %v388_v7  ;;  %334 = vmatpush3.bf16.msra.mxu0 %v388_v7 }
  0x10   :  { %365 = vmatprep.subr.bf16.mxu1 %v389_v8  ;;  %335 = vmatprep.subr.bf16.mxu0 %v389_v8 }
  0x13   :  { %373 = vmatpush3.bf16.msra.mxu1 %v390_v9  ;;  %336 = vmatpush3.bf16.msra.mxu0 %v390_v9 }
  0x14   :  { %8 = vsyncpa [#allocation4], 0  ;;  %366 = vmatprep.subr.bf16.mxu1 %v391_v10  ;;  %337 = vmatprep.subr.bf16.mxu0 %v391_v10  ;;  %v393_v14 = vld [vmem:[%s547_s1 + $0x70] sm:$0xff]   ;;  %v395_v16 = vld [vmem:[%s547_s1 + $0x78] sm:$0xff]   ;;  %vm20_vm0 = vcmask 367616   ;;  %v429_v23 = vmov 0.0  }
  0x15   :  { %231 = vmatprep.mubr.bf16.mxu1 %v399_v11  ;;  %223 = vmatprep.mubr.bf16.mxu0 %v402_v12  ;;  %v394_v15 = vld [vmem:[%s547_s1 + $0x30] sm:$0xff]   ;;  %v396_v17 = vld [vmem:[%s547_s1 + $0x38] sm:$0xff]   ;;  %v35_v18 = vld [vmem:[%s546_s0 + $0x20] sm:$0xff]  ;;  %23 = vst.msk [vmem:[#allocation2 + $0x10] sm:$0xff] %vm20_vm0, %v429_v23 }
  0x16   :  { %v397_v19 = vld [vmem:[%s546_s0 + $0x10] ss:$8 sps:$4 sm:$0xff]   ;;  %v400_v20 = vld [vmem:[%s546_s0] ss:$8 sps:$4 sm:$0xff]   ;;  %v309_v21 = vcombine.high %v35_v18, %v35_v18  ;;  %v308_v22 = vcombine.low %v35_v18, %v35_v18  ;;  %21 = vst.msk [vmem:[#allocation2] sm:$0xff] %vm20_vm0, %v429_v23  ;;  %22 = vst.msk [vmem:[#allocation2 + $0x8] sm:$0xff] %vm20_vm0, %v429_v23 }
  0x17   :  { %374 = vmatpush3.bf16.msra.mxu1 %v392_v13  ;;  %338 = vmatpush3.bf16.msra.mxu0 %v392_v13  ;;  %24 = vst.msk [vmem:[#allocation2 + $0x18] sm:$0xff] %vm20_vm0, %v429_v23  ;;  %25 = vst.msk [vmem:[#allocation2 + $0x20] sm:$0xff] %vm20_vm0, %v429_v23  ;;  %v326_v50 = vld [vmem:[%s548_s2] ss:$0 sm:$0xff]  ;;  %s430_s2 = smov [#allocation3]  }
  0x18   :  { %367 = vmatprep.subr.bf16.mxu1 %v393_v14  ;;  %339 = vmatprep.subr.bf16.mxu0 %v393_v14  ;;  %s293_s27 = sshll.u32 %s430_s2, 4  ;;  %s294_s27 = int_to_ptr.vmem [resolvable:$true] %s293_s27 }
  0x19   :  { %s405_s28 = scalar_lea.vmem %s294_s27, 640  ;;  %p410_p1 = scmp.lt.s32.totalorder %s294_s27, %s294_s27 }
  0x1a   :  { %p406_p0 = scmp.ne.s32.totalorder %s294_s27, %s405_s28  ;;  %p411_p2 = scmp.lt.s32.totalorder %s405_s28, %s405_s28 }
  0x1b   :  { %375 = vmatpush3.bf16.msra.mxu1 %v394_v15  ;;  %340 = vmatpush3.bf16.msra.mxu0 %v394_v15 }
  0x1c   :  { %368 = vmatprep.subr.bf16.mxu1 %v395_v16  ;;  %341 = vmatprep.subr.bf16.mxu0 %v395_v16  ;;  %v28_v26 = vld [vmem:[#allocation2 + $0x10] sm:$0xff]  ;;  %p412_p3 = por %p411_p2, %p410_p1 }
  0x1d   :  { %v26_v28 = vld [vmem:[#allocation2] sm:$0xff]  ;;  %v27_v36 = vld [vmem:[#allocation2 + $0x8] sm:$0xff] }
  0x1e   :  { %v29_v34 = vld [vmem:[#allocation2 + $0x18] sm:$0xff]  ;;  %v30_v45 = vld [vmem:[#allocation2 + $0x20] sm:$0xff]  ;;  %p413_p4 = pnand %p412_p3, %p406_p0 }
  0x1f   :  { %376 = vmatpush3.bf16.msra.mxu1 %v396_v17  ;;  %342 = vmatpush3.bf16.msra.mxu0 %v396_v17 }
  0x22   :  { %232 = vmatmul.mubr.bf16.vlgmr.msra.gmra.mrb[0].mxu1 %v397_v19  ;;  %224 = vmatmul.mubr.bf16.vlgmr.msra.gmra.mrb[0].mxu0 %v400_v20 }
  0x23   :  { %239 = vmatprep.mubr.bf16.mxu1 %v309_v21 }
  0x2a   :  { %240 = vmatmul.mubr.bf16.gmra.mrb[4].mxu1 %v308_v22 }
  0xf5   :  { %v349_v24 = vpop.f32.mrb[0].mxu1  ;;  %v343_v25 = vpop.f32.mrb[0].mxu0 }
  0xf6   :  { %v350_v27 = vpop.f32.mrb[1].mxu1  ;;  %v344_v29 = vpop.f32.mrb[1].mxu0 }
  0xf7   :  { %v351_v30 = vadd.f32 %v350_v27, %v349_v24  ;;  %v352_v31 = vpop.f32.mrb[2].mxu1  ;;  %v345_v32 = vadd.f32 %v344_v29, %v343_v25  ;;  %v346_v33 = vpop.f32.mrb[2].mxu0 }
  0xf8   :  { %v353_v35 = vpop.f32.mrb[3].mxu1  ;;  %v347_v37 = vpop.f32.mrb[3].mxu0 }
  0xf9   :  { %v249_v38 = vadd.f32 %v351_v30, %v28_v26  ;;  %v354_v39 = vadd.f32 %v353_v35, %v352_v31  ;;  %v247_v40 = vadd.f32 %v345_v32, %v26_v28  ;;  %v348_v41 = vadd.f32 %v347_v37, %v346_v33 }
  0xfb   :  { %255 = vst.msk [vmem:[#allocation2 + $0x10] sm:$0xff] %vm20_vm0, %v249_v38  ;;  %v250_v42 = vadd.f32 %v354_v39, %v29_v34  ;;  %253 = vst.msk [vmem:[#allocation2] sm:$0xff] %vm20_vm0, %v247_v40  ;;  %v248_v43 = vadd.f32 %v348_v41, %v27_v36 }
  0xfd   :  { %256 = vst.msk [vmem:[#allocation2 + $0x18] sm:$0xff] %vm20_vm0, %v250_v42  ;;  %254 = vst.msk [vmem:[#allocation2 + $0x8] sm:$0xff] %vm20_vm0, %v248_v43  ;;  %v355_v44 = vpop.f32.mrb[4].mxu1 }
  0xfe   :  { %v356_v46 = vpop.f32.mrb[5].mxu1 }
  0xff   :  { %v357_v47 = vadd.f32 %v356_v46, %v355_v44  ;;  %v358_v48 = vpop.f32.mrb[6].mxu1 }
 0x100   :  { %v359_v49 = vpop.f32.mrb[7].mxu1 }
 0x101   :  { %v251_v51 = vadd.f32 %v357_v47, %v30_v45 }
 0x102   :  { %v261_v52 = vld [vmem:[#allocation2] sm:$0xff]  ;;  %v263_v53 = vld [vmem:[#allocation2 + $0x10] sm:$0xff] }
 0x103   :  { %257 = vst.msk [vmem:[#allocation2 + $0x20] sm:$0xff] %vm20_vm0, %v251_v51  ;;  %v273_v54 = vadd.f32 %v326_v50, %v261_v52  ;;  %v275_v55 = vadd.f32 %v326_v50, %v263_v53 }
 0x104   :  { %v262_v56 = vld [vmem:[#allocation2 + $0x8] sm:$0xff]  ;;  %v264_v57 = vld [vmem:[#allocation2 + $0x18] sm:$0xff] }
 0x105   :  { %v274_v58 = vadd.f32 %v326_v50, %v262_v56  ;;  %v276_v59 = vadd.f32 %v326_v50, %v264_v57  ;;  %v278_v60 = vmax.f32 %v273_v54, 0.0  ;;  %v280_v61 = vmax.f32 %v275_v55, 0.0 }
 0x107   :  { %v279_v62 = vmax.f32 %v274_v58, 0.0  ;;  %v281_v63 = vmax.f32 %v276_v59, 0.0  ;;  %283 = vst.msk [vmem:[#allocation3] sm:$0xff] %vm20_vm0, %v278_v60  ;;  %285 = vst.msk [vmem:[#allocation3 + $0x10] sm:$0xff] %vm20_vm0, %v280_v61 }
 0x109   :  { %284 = vst.msk [vmem:[#allocation3 + $0x8] sm:$0xff] %vm20_vm0, %v279_v62  ;;  %286 = vst.msk [vmem:[#allocation3 + $0x18] sm:$0xff] %vm20_vm0, %v281_v63 }
 0x10a   :  { %v265_v0 = vld [vmem:[#allocation2 + $0x20] sm:$0xff] }
 0x10b   :  { %v277_v1 = vadd.f32 %v326_v50, %v265_v0 }
 0x10d   :  { %v282_v2 = vmax.f32 %v277_v1, 0.0 }
 0x10f   :  { %287 = vst.msk [vmem:[#allocation3 + $0x20] sm:$0xff] %vm20_vm0, %v282_v2 }
 0x110   :  { %416 = shalt.err (!%p413_p4)
}
 0x111   :  { %s417_s4 = scalar_lea.hbm %s549_s3, 640 }
 0x112   :  { %p418_p5 = scmp.ne.s32.totalorder %s549_s3, %s417_s4  ;;  %p421_p6 = scmp.lt.u32.totalorder %s417_s4, %s549_s3 }
 0x114   :  { %p423_p7 = pnand %p421_p6, %p418_p5 }
 0x116   :  { %426 = shalt.err (!%p423_p7)
}
 0x117   :  { %s431_s9 = smov 128   ;;  %s432_s10 = smov 8  }
 0x118   :  { %299 = dma.vmem_to_hbm [thread:$0]  %s294_s27, 640, %s549_s3, [#allocation4], %s431_s9, %s431_s9, %s432_s10  }
 0x119   :  { %427 = dma.done.wait [#allocation4], 640  }
 0x11a   :  { %428 = vsyncadd [#allocation4], 4294966656 }
 0x11b   :  { %303 = vsyncpa [#allocation4], 1 }

</bundles_post_ra>
